<compile_context>
chip_gen: v5e
topology: v5e:2x2
jax: 0.10.0
libtpu: 0.0.40
codegen_flags: <defaults>
</compile_context>

<pallas_src>
import jax
import jax.numpy as jnp
from jax import lax
from jax.experimental import pallas as pl
from jax.experimental.pallas import tpu as pltpu


# ----------------------------------------------------------------------------
# Glue: block-Toeplitz conv matrices (3x3, stride 1, pad 1) with BN scale folded in.
# Activation-row lane layout (W*cin lanes): lane = w*cin + ch  (w major, channel minor).
# Returns (3, W*cin, W*cout): one matrix per kernel row dh; out-of-range W taps are 0,
# which implements the W-direction zero padding without any padded lanes.
# ----------------------------------------------------------------------------
def build_conv_mat(w_oihw, scale, cin, cout, W):
    pc = jnp.repeat(jnp.arange(W, dtype=jnp.int32), cin)        # in lane  -> pixel col
    ch = jnp.tile(jnp.arange(cin, dtype=jnp.int32), W)          # in lane  -> channel
    ow = jnp.repeat(jnp.arange(W, dtype=jnp.int32), cout)       # out lane -> pixel col
    oc = jnp.tile(jnp.arange(cout, dtype=jnp.int32), W)         # out lane -> channel
    dw = pc[:, None] - ow[None, :] + 1                          # kernel tap index (W dir)
    valid = (dw >= 0) & (dw <= 2)
    dwc = jnp.clip(dw, 0, 2)
    mats = []
    for dh in range(3):
        wdh = w_oihw[:, :, dh, :]                                # (cout, cin, 3)
        g = wdh[oc[None, :], ch[:, None], dwc]                   # (W*cin, W*cout)
        mats.append(jnp.where(valid, g, 0.0) * scale[oc][None, :])
    return jnp.stack(mats, axis=0)                               # (3, W*cin, W*cout)


# ----------------------------------------------------------------------------
# Fully fused forward:  ResNetFull.forward
#   out = TimeDistributed(fmodel)(x); out = mean(out, dim=1); out = flatten(out, 1)
#   out = classifier(out)
# ----------------------------------------------------------------------------
def resnet_full_forward(x, params):
    B, T, Cin, H, W = x.shape
    C1 = params["conv1_w"].shape[0]
    K = params["fc_w"].shape[0]
    KP = 128                       # lane-dense (padded) logits width
    TH = T * H
    LW = W * C1                    # activation lane width (=128 here)
    WCin = W * Cin                 # stem input lane width

    # ---- glue: per-frame activation rows, (B, T*H, W*Cin) f32 (no im2col in HBM) ----------
    x_in = jnp.transpose(x, (0, 1, 3, 4, 2)).reshape(B, TH, WCin).astype(jnp.float32)

    # ---- glue: conv matrices with BN folded; classifier folded with the mean/pool ----------
    m1 = build_conv_mat(params["conv1_w"], params["bn1_s"], Cin, C1, W)
    m1 = m1.reshape(3 * WCin, LW).astype(jnp.bfloat16)
    b1 = jnp.tile(params["bn1_b"], W).reshape(1, LW).astype(jnp.float32)
    m2 = build_conv_mat(params["blk_w1"], params["blk_s1"], C1, C1, W)
    m2 = m2.reshape(3 * LW, LW).astype(jnp.bfloat16)
    b2 = jnp.tile(params["blk_b1"], W).reshape(1, LW).astype(jnp.float32)
    m3 = build_conv_mat(params["blk_w2"], params["blk_s2"], C1, C1, W)
    m3 = m3.reshape(3 * LW, LW).astype(jnp.bfloat16)
    b3 = jnp.tile(params["blk_b2"], W).reshape(1, LW).astype(jnp.float32)

    sel = jnp.tile(jnp.eye(C1, dtype=jnp.float32), (W, 1))      # (W*C1, C1): sum over w
    wc_core = (sel @ params["fc_w"].T) / float(T * H * W)       # pool + time-mean + FC
    wc = jnp.zeros((LW, KP), jnp.float32).at[:, :K].set(wc_core)
    bc = jnp.zeros((1, KP), jnp.float32).at[0, :K].set(params["fc_b"])

    # ---- the single fused kernel ------------------------------------------------------------
    def kernel(x_ref, m1_ref, b1_ref, m2_ref, b2_ref, m3_ref, b3_ref,
               wc_ref, bc_ref, o_ref, pad0_ref, pad_ref):
        # zero-bordered per-frame scratches: rows 0 and H+1 stay zero -> conv H padding
        pad0_ref[...] = jnp.zeros_like(pad0_ref)
        pad_ref[...] = jnp.zeros_like(pad_ref)

        # ---- conv stem + BN + ReLU: one MXU matmul over all T frames of this sample ----
        pad0_ref[:, 1:H + 1, :] = x_ref[0].reshape(T, H, WCin)
        xs = jnp.concatenate([pad0_ref[:, dh:dh + H, :] for dh in range(3)], axis=-1)
        xs = xs.reshape(TH, 3 * WCin).astype(jnp.bfloat16)
        h1 = jnp.dot(xs, m1_ref[...], preferred_element_type=jnp.float32)
        h1 = jnp.maximum(h1 + b1_ref[...], 0.0)                  # (T*H, W*C1) f32

        def conv_block(act, m_ref, b_ref):
            pad_ref[:, 1:H + 1, :] = act.reshape(T, H, LW)
            x3 = jnp.concatenate([pad_ref[:, dh:dh + H, :] for dh in range(3)], axis=-1)
            x3 = x3.reshape(TH, 3 * LW).astype(jnp.bfloat16)
            return (jnp.dot(x3, m_ref[...], preferred_element_type=jnp.float32)
                    + b_ref[...])

        # ---- BasicBlock: conv+BN+ReLU, conv+BN, +identity, ReLU ----
        h2 = jnp.maximum(conv_block(h1, m2_ref, b2_ref), 0.0)
        h3 = jnp.maximum(conv_block(h2, m3_ref, b3_ref) + h1, 0.0)

        # ---- global avg-pool over (T,H,W) + mean over time + Linear (folded in wc/bc) ----
        rowsum = jnp.sum(h3, axis=0, keepdims=True)              # (1, W*C1)
        o_ref[0] = (jnp.dot(rowsum, wc_ref[...], preferred_element_type=jnp.float32)
                    + bc_ref[...])

    out = pl.pallas_call(
        kernel,
        out_shape=jax.ShapeDtypeStruct((B, 1, KP), jnp.float32),
        grid=(B,),
        in_specs=[
            pl.BlockSpec((1, TH, WCin), lambda b: (b, 0, 0)),
            pl.BlockSpec((3 * WCin, LW), lambda b: (0, 0)),
            pl.BlockSpec((1, LW), lambda b: (0, 0)),
            pl.BlockSpec((3 * LW, LW), lambda b: (0, 0)),
            pl.BlockSpec((1, LW), lambda b: (0, 0)),
            pl.BlockSpec((3 * LW, LW), lambda b: (0, 0)),
            pl.BlockSpec((1, LW), lambda b: (0, 0)),
            pl.BlockSpec((LW, KP), lambda b: (0, 0)),
            pl.BlockSpec((1, KP), lambda b: (0, 0)),
        ],
        out_specs=pl.BlockSpec((1, 1, KP), lambda b: (b, 0, 0)),
        scratch_shapes=[pltpu.VMEM((T, H + 2, WCin), jnp.float32),
                        pltpu.VMEM((T, H + 2, LW), jnp.float32)],
        compiler_params=pltpu.CompilerParams(dimension_semantics=("parallel",)),
    )(x_in, m1, b1, m2, b2, m3, b3, wc, bc)

    return out[:, 0, :K]


# ----------------------------------------------------------------------------
# Pure-JAX reference (for correctness check).
# ----------------------------------------------------------------------------
def ref_forward(x, params):
    b, t, c, h, w = x.shape
    xn = x.reshape(b * t, c, h, w).transpose(0, 2, 3, 1).astype(jnp.float32)

    def conv(z, wt, s, bi, res=None):
        wh = jnp.transpose(wt, (2, 3, 1, 0))
        y = lax.conv_general_dilated(z, wh, (1, 1), "SAME",
                                     dimension_numbers=("NHWC", "HWIO", "NHWC"))
        y = y * s + bi
        if res is not None:
            y = y + res
        return jnp.maximum(y, 0.0)

    h1 = conv(xn, params["conv1_w"], params["bn1_s"], params["bn1_b"])
    h2 = conv(h1, params["blk_w1"], params["blk_s1"], params["blk_b1"])
    h3 = conv(h2, params["blk_w2"], params["blk_s2"], params["blk_b2"], res=h1)
    feats = jnp.mean(h3.reshape(b, t, h * w, -1), axis=(1, 2))
    return feats @ params["fc_w"].T + params["fc_b"]


# ----------------------------------------------------------------------------
# Deterministic parameter construction (synthetic fmodel + cmodel, since they
# are constructor arguments in the PyTorch module).
# ----------------------------------------------------------------------------
def make_params(key, c_in, c1, num_classes):
    ks = jax.random.split(key, 16)

    def bn(kg, kb, km, kv, c):
        gamma = 1.0 + 0.1 * jax.random.normal(kg, (c,), jnp.float32)
        beta = 0.1 * jax.random.normal(kb, (c,), jnp.float32)
        mean = 0.1 * jax.random.normal(km, (c,), jnp.float32)
        var = jax.random.uniform(kv, (c,), jnp.float32, 0.5, 1.5)
        scale = gamma / jnp.sqrt(var + 1e-5)
        return scale, beta - mean * scale

    bn1_s, bn1_b = bn(ks[1], ks[2], ks[3], ks[4], c1)
    blk_s1, blk_b1 = bn(ks[6], ks[7], ks[8], ks[9], c1)
    blk_s2, blk_b2 = bn(ks[11], ks[12], ks[13], ks[14], c1)
    return {
        "conv1_w": 0.1 * jax.random.normal(ks[0], (c1, c_in, 3, 3), jnp.float32),
        "bn1_s": bn1_s, "bn1_b": bn1_b,
        "blk_w1": 0.1 * jax.random.normal(ks[5], (c1, c1, 3, 3), jnp.float32),
        "blk_s1": blk_s1, "blk_b1": blk_b1,
        "blk_w2": 0.1 * jax.random.normal(ks[10], (c1, c1, 3, 3), jnp.float32),
        "blk_s2": blk_s2, "blk_b2": blk_b2,
        "fc_w": 0.1 * jax.random.normal(ks[15], (num_classes, c1), jnp.float32),
        "fc_b": 0.01 * jnp.arange(num_classes, dtype=jnp.float32),
    }


if __name__ == "__main__":
    B, T, C, H, W = 2, 4, 4, 16, 16
    C1, NUM_CLASSES = 8, 7

    key = jax.random.PRNGKey(0)
    kx, kp = jax.random.split(key)
    x = jax.random.normal(kx, (B, T, C, H, W), jnp.float32)
    params = make_params(kp, C, C1, NUM_CLASSES)

    fwd = jax.jit(resnet_full_forward)
    out = jax.block_until_ready(fwd(x, params))
    ref = jax.block_until_ready(ref_forward(x, params))

    assert out.shape == (B, NUM_CLASSES), out.shape
    max_diff = float(jnp.max(jnp.abs(out - ref)))
    assert jnp.allclose(out, ref, atol=3e-2, rtol=3e-2), f"max abs diff {max_diff}"
    print("KERNEL_OK")
</pallas_src>

<mosaic_0001>
module attributes {stable_mosaic.version = 11 : i64} {
  func.func @kernel(%arg0: i32, %arg1: memref<1x64x64xf32, #tpu.memory_space<vmem>>, %arg2: memref<192x128xbf16, #tpu.memory_space<vmem>>, %arg3: memref<1x128xf32, #tpu.memory_space<vmem>>, %arg4: memref<384x128xbf16, #tpu.memory_space<vmem>>, %arg5: memref<1x128xf32, #tpu.memory_space<vmem>>, %arg6: memref<384x128xbf16, #tpu.memory_space<vmem>>, %arg7: memref<1x128xf32, #tpu.memory_space<vmem>>, %arg8: memref<128x128xf32, #tpu.memory_space<vmem>>, %arg9: memref<1x128xf32, #tpu.memory_space<vmem>>, %arg10: memref<1x1x128xf32, #tpu.memory_space<vmem>>, %arg11: memref<4x18x64xf32, #tpu.memory_space<vmem>>, %arg12: memref<4x18x128xf32, #tpu.memory_space<vmem>>) attributes {dimension_semantics = [#tpu.dimension_semantics<parallel>], iteration_bounds = array<i64: 2>, scalar_prefetch = 0 : i64, scratch_operands = 2 : i64, tpu.core_type = #tpu.core_type<tc>, window_params = [{transform_indices = @transform_0, window_bounds = array<i64: 1, 64, 64>}, {pipeline_mode = #tpu.pipeline_mode<synchronous>, transform_indices = @transform_1, window_bounds = array<i64: 192, 128>}, {pipeline_mode = #tpu.pipeline_mode<synchronous>, transform_indices = @transform_2, window_bounds = array<i64: 1, 128>}, {pipeline_mode = #tpu.pipeline_mode<synchronous>, transform_indices = @transform_3, window_bounds = array<i64: 384, 128>}, {pipeline_mode = #tpu.pipeline_mode<synchronous>, transform_indices = @transform_4, window_bounds = array<i64: 1, 128>}, {pipeline_mode = #tpu.pipeline_mode<synchronous>, transform_indices = @transform_5, window_bounds = array<i64: 384, 128>}, {pipeline_mode = #tpu.pipeline_mode<synchronous>, transform_indices = @transform_6, window_bounds = array<i64: 1, 128>}, {pipeline_mode = #tpu.pipeline_mode<synchronous>, transform_indices = @transform_7, window_bounds = array<i64: 128, 128>}, {pipeline_mode = #tpu.pipeline_mode<synchronous>, transform_indices = @transform_8, window_bounds = array<i64: 1, 128>}, {transform_indices = @transform_9, window_bounds = array<i64: 1, 1, 128>}]} {
    %cst = arith.constant 0.000000e+00 : f32
    %0 = vector.broadcast %cst : f32 to vector<4x18x64xf32>
    %c0 = arith.constant 0 : index
    %c0_0 = arith.constant 0 : index
    %c0_1 = arith.constant 0 : index
    %1 = vector.load %arg11[%c0, %c0_0, %c0_1] : memref<4x18x64xf32, #tpu.memory_space<vmem>>, vector<4x18x64xf32>
    tpu.vector_store %arg11[%c0, %c0_0, %c0_1], %0 {strides = array<i32>} : memref<4x18x64xf32, #tpu.memory_space<vmem>>, vector<4x18x64xf32>,
    %cst_2 = arith.constant 0.000000e+00 : f32
    %2 = vector.broadcast %cst_2 : f32 to vector<4x18x128xf32>
    %c0_3 = arith.constant 0 : index
    %c0_4 = arith.constant 0 : index
    %c0_5 = arith.constant 0 : index
    %3 = vector.load %arg12[%c0_3, %c0_4, %c0_5] : memref<4x18x128xf32, #tpu.memory_space<vmem>>, vector<4x18x128xf32>
    tpu.vector_store %arg12[%c0_3, %c0_4, %c0_5], %2 {strides = array<i32>} : memref<4x18x128xf32, #tpu.memory_space<vmem>>, vector<4x18x128xf32>,
    %c0_6 = arith.constant 0 : index
    %c0_7 = arith.constant 0 : index
    %c0_8 = arith.constant 0 : index
    %4 = vector.load %arg1[%c0_6, %c0_7, %c0_8] : memref<1x64x64xf32, #tpu.memory_space<vmem>>, vector<1x64x64xf32>
    %5 = vector.shape_cast %4 : vector<1x64x64xf32> to vector<64x64xf32>
    %6 = vector.shape_cast %5 : vector<64x64xf32> to vector<4x16x64xf32>
    %c0_9 = arith.constant 0 : index
    %c1 = arith.constant 1 : index
    %c0_10 = arith.constant 0 : index
    %7 = vector.load %arg11[%c0_9, %c1, %c0_10] : memref<4x18x64xf32, #tpu.memory_space<vmem>>, vector<4x16x64xf32>
    tpu.vector_store %arg11[%c0_9, %c1, %c0_10], %6 {strides = array<i32>} : memref<4x18x64xf32, #tpu.memory_space<vmem>>, vector<4x16x64xf32>,
    %c0_11 = arith.constant 0 : index
    %c0_12 = arith.constant 0 : index
    %c0_13 = arith.constant 0 : index
    %8 = vector.load %arg11[%c0_11, %c0_12, %c0_13] : memref<4x18x64xf32, #tpu.memory_space<vmem>>, vector<4x16x64xf32>
    %c0_14 = arith.constant 0 : index
    %c1_15 = arith.constant 1 : index
    %c0_16 = arith.constant 0 : index
    %9 = vector.load %arg11[%c0_14, %c1_15, %c0_16] : memref<4x18x64xf32, #tpu.memory_space<vmem>>, vector<4x16x64xf32>
    %c0_17 = arith.constant 0 : index
    %c2 = arith.constant 2 : index
    %c0_18 = arith.constant 0 : index
    %10 = vector.load %arg11[%c0_17, %c2, %c0_18] : memref<4x18x64xf32, #tpu.memory_space<vmem>>, vector<4x16x64xf32>
    %11 = tpu.concatenate %8, %9, %10 in 2 : vector<4x16x64xf32>, vector<4x16x64xf32>, vector<4x16x64xf32> -> vector<4x16x192xf32>
    %12 = vector.shape_cast %11 : vector<4x16x192xf32> to vector<64x192xf32>
    %13 = arith.truncf %12 : vector<64x192xf32> to vector<64x192xbf16>
    %c0_19 = arith.constant 0 : index
    %c0_20 = arith.constant 0 : index
    %14 = vector.load %arg2[%c0_19, %c0_20] : memref<192x128xbf16, #tpu.memory_space<vmem>>, vector<192x128xbf16>
    %cst_21 = arith.constant dense<0.000000e+00> : vector<64x128xf32>
    %15 = tpu.matmul %13, %14, %cst_21 {dimension_numbers = #tpu.dot_dimension_numbers<[1], [0], [0], [1], [0, 0, 1, 1], [], []>} : vector<64x192xbf16>, vector<192x128xbf16>, vector<64x128xf32> -> vector<64x128xf32>
    %c0_22 = arith.constant 0 : index
    %c0_23 = arith.constant 0 : index
    %16 = vector.load %arg3[%c0_22, %c0_23] : memref<1x128xf32, #tpu.memory_space<vmem>>, vector<1x128xf32>
    %17 = vector.broadcast %16 : vector<1x128xf32> to vector<64x128xf32>
    %18 = arith.addf %15, %17 : vector<64x128xf32>
    %cst_24 = arith.constant 0.000000e+00 : f32
    %19 = vector.broadcast %cst_24 : f32 to vector<64x128xf32>
    %20 = arith.maximumf %18, %19 : vector<64x128xf32>
    %21 = vector.shape_cast %20 : vector<64x128xf32> to vector<4x16x128xf32>
    %c0_25 = arith.constant 0 : index
    %c1_26 = arith.constant 1 : index
    %c0_27 = arith.constant 0 : index
    %22 = vector.load %arg12[%c0_25, %c1_26, %c0_27] : memref<4x18x128xf32, #tpu.memory_space<vmem>>, vector<4x16x128xf32>
    tpu.vector_store %arg12[%c0_25, %c1_26, %c0_27], %21 {strides = array<i32>} : memref<4x18x128xf32, #tpu.memory_space<vmem>>, vector<4x16x128xf32>,
    %c0_28 = arith.constant 0 : index
    %c0_29 = arith.constant 0 : index
    %c0_30 = arith.constant 0 : index
    %23 = vector.load %arg12[%c0_28, %c0_29, %c0_30] : memref<4x18x128xf32, #tpu.memory_space<vmem>>, vector<4x16x128xf32>
    %c0_31 = arith.constant 0 : index
    %c1_32 = arith.constant 1 : index
    %c0_33 = arith.constant 0 : index
    %24 = vector.load %arg12[%c0_31, %c1_32, %c0_33] : memref<4x18x128xf32, #tpu.memory_space<vmem>>, vector<4x16x128xf32>
    %c0_34 = arith.constant 0 : index
    %c2_35 = arith.constant 2 : index
    %c0_36 = arith.constant 0 : index
    %25 = vector.load %arg12[%c0_34, %c2_35, %c0_36] : memref<4x18x128xf32, #tpu.memory_space<vmem>>, vector<4x16x128xf32>
    %26 = tpu.concatenate %23, %24, %25 in 2 : vector<4x16x128xf32>, vector<4x16x128xf32>, vector<4x16x128xf32> -> vector<4x16x384xf32>
    %27 = vector.shape_cast %26 : vector<4x16x384xf32> to vector<64x384xf32>
    %28 = arith.truncf %27 : vector<64x384xf32> to vector<64x384xbf16>
    %c0_37 = arith.constant 0 : index
    %c0_38 = arith.constant 0 : index
    %29 = vector.load %arg4[%c0_37, %c0_38] : memref<384x128xbf16, #tpu.memory_space<vmem>>, vector<384x128xbf16>
    %cst_39 = arith.constant dense<0.000000e+00> : vector<64x128xf32>
    %30 = tpu.matmul %28, %29, %cst_39 {dimension_numbers = #tpu.dot_dimension_numbers<[1], [0], [0], [1], [0, 0, 1, 1], [], []>} : vector<64x384xbf16>, vector<384x128xbf16>, vector<64x128xf32> -> vector<64x128xf32>
    %c0_40 = arith.constant 0 : index
    %c0_41 = arith.constant 0 : index
    %31 = vector.load %arg5[%c0_40, %c0_41] : memref<1x128xf32, #tpu.memory_space<vmem>>, vector<1x128xf32>
    %32 = vector.broadcast %31 : vector<1x128xf32> to vector<64x128xf32>
    %33 = arith.addf %30, %32 : vector<64x128xf32>
    %cst_42 = arith.constant 0.000000e+00 : f32
    %34 = vector.broadcast %cst_42 : f32 to vector<64x128xf32>
    %35 = arith.maximumf %33, %34 : vector<64x128xf32>
    %36 = vector.shape_cast %35 : vector<64x128xf32> to vector<4x16x128xf32>
    %c0_43 = arith.constant 0 : index
    %c1_44 = arith.constant 1 : index
    %c0_45 = arith.constant 0 : index
    %37 = vector.load %arg12[%c0_43, %c1_44, %c0_45] : memref<4x18x128xf32, #tpu.memory_space<vmem>>, vector<4x16x128xf32>
    tpu.vector_store %arg12[%c0_43, %c1_44, %c0_45], %36 {strides = array<i32>} : memref<4x18x128xf32, #tpu.memory_space<vmem>>, vector<4x16x128xf32>,
    %c0_46 = arith.constant 0 : index
    %c0_47 = arith.constant 0 : index
    %c0_48 = arith.constant 0 : index
    %38 = vector.load %arg12[%c0_46, %c0_47, %c0_48] : memref<4x18x128xf32, #tpu.memory_space<vmem>>, vector<4x16x128xf32>
    %c0_49 = arith.constant 0 : index
    %c1_50 = arith.constant 1 : index
    %c0_51 = arith.constant 0 : index
    %39 = vector.load %arg12[%c0_49, %c1_50, %c0_51] : memref<4x18x128xf32, #tpu.memory_space<vmem>>, vector<4x16x128xf32>
    %c0_52 = arith.constant 0 : index
    %c2_53 = arith.constant 2 : index
    %c0_54 = arith.constant 0 : index
    %40 = vector.load %arg12[%c0_52, %c2_53, %c0_54] : memref<4x18x128xf32, #tpu.memory_space<vmem>>, vector<4x16x128xf32>
    %41 = tpu.concatenate %38, %39, %40 in 2 : vector<4x16x128xf32>, vector<4x16x128xf32>, vector<4x16x128xf32> -> vector<4x16x384xf32>
    %42 = vector.shape_cast %41 : vector<4x16x384xf32> to vector<64x384xf32>
    %43 = arith.truncf %42 : vector<64x384xf32> to vector<64x384xbf16>
    %c0_55 = arith.constant 0 : index
    %c0_56 = arith.constant 0 : index
    %44 = vector.load %arg6[%c0_55, %c0_56] : memref<384x128xbf16, #tpu.memory_space<vmem>>, vector<384x128xbf16>
    %cst_57 = arith.constant dense<0.000000e+00> : vector<64x128xf32>
    %45 = tpu.matmul %43, %44, %cst_57 {dimension_numbers = #tpu.dot_dimension_numbers<[1], [0], [0], [1], [0, 0, 1, 1], [], []>} : vector<64x384xbf16>, vector<384x128xbf16>, vector<64x128xf32> -> vector<64x128xf32>
    %c0_58 = arith.constant 0 : index
    %c0_59 = arith.constant 0 : index
    %46 = vector.load %arg7[%c0_58, %c0_59] : memref<1x128xf32, #tpu.memory_space<vmem>>, vector<1x128xf32>
    %47 = vector.broadcast %46 : vector<1x128xf32> to vector<64x128xf32>
    %48 = arith.addf %45, %47 : vector<64x128xf32>
    %49 = arith.addf %48, %20 : vector<64x128xf32>
    %cst_60 = arith.constant 0.000000e+00 : f32
    %50 = vector.broadcast %cst_60 : f32 to vector<64x128xf32>
    %51 = arith.maximumf %49, %50 : vector<64x128xf32>
    %cst_61 = arith.constant dense<0.000000e+00> : vector<128xf32>
    %52 = vector.multi_reduction <add>, %51, %cst_61 [0] : vector<64x128xf32> to vector<128xf32>
    %53 = vector.shape_cast %52 : vector<128xf32> to vector<1x128xf32>
    %c0_62 = arith.constant 0 : index
    %c0_63 = arith.constant 0 : index
    %54 = vector.load %arg8[%c0_62, %c0_63] : memref<128x128xf32, #tpu.memory_space<vmem>>, vector<128x128xf32>
    %cst_64 = arith.constant dense<0.000000e+00> : vector<1x128xf32>
    %55 = tpu.matmul %53, %54, %cst_64 {dimension_numbers = #tpu.dot_dimension_numbers<[1], [0], [0], [1], [0, 0, 1, 1], [], []>} : vector<1x128xf32>, vector<128x128xf32>, vector<1x128xf32> -> vector<1x128xf32>
    %c0_65 = arith.constant 0 : index
    %c0_66 = arith.constant 0 : index
    %56 = vector.load %arg9[%c0_65, %c0_66] : memref<1x128xf32, #tpu.memory_space<vmem>>, vector<1x128xf32>
    %57 = arith.addf %55, %56 : vector<1x128xf32>
    %c0_67 = arith.constant 0 : index
    %c0_68 = arith.constant 0 : index
    %c0_69 = arith.constant 0 : index
    %58 = vector.load %arg10[%c0_67, %c0_68, %c0_69] : memref<1x1x128xf32, #tpu.memory_space<vmem>>, vector<1x1x128xf32>
    %59 = vector.shape_cast %58 : vector<1x1x128xf32> to vector<1x128xf32>
    %60 = vector.shape_cast %57 : vector<1x128xf32> to vector<1x1x128xf32>
    tpu.vector_store %arg10[%c0_67, %c0_68, %c0_69], %60 {strides = array<i32>} : memref<1x1x128xf32, #tpu.memory_space<vmem>>, vector<1x1x128xf32>,
    return
  }
  func.func @transform_0(%arg0: i32) -> (i32, i32, i32) {
    %c0_i32 = arith.constant 0 : i32
    %c0_i32_0 = arith.constant 0 : i32
    %c0_i32_1 = arith.constant 0 : i32
    return %arg0, %c0_i32, %c0_i32_0 : i32, i32, i32
  }
  func.func @transform_1(%arg0: i32) -> (i32, i32) {
    %c0_i32 = arith.constant 0 : i32
    %c0_i32_0 = arith.constant 0 : i32
    %c0_i32_1 = arith.constant 0 : i32
    return %c0_i32, %c0_i32_0 : i32, i32
  }
  func.func @transform_2(%arg0: i32) -> (i32, i32) {
    %c0_i32 = arith.constant 0 : i32
    %c0_i32_0 = arith.constant 0 : i32
    %c0_i32_1 = arith.constant 0 : i32
    return %c0_i32, %c0_i32_0 : i32, i32
  }
  func.func @transform_3(%arg0: i32) -> (i32, i32) {
    %c0_i32 = arith.constant 0 : i32
    %c0_i32_0 = arith.constant 0 : i32
    %c0_i32_1 = arith.constant 0 : i32
    return %c0_i32, %c0_i32_0 : i32, i32
  }
  func.func @transform_4(%arg0: i32) -> (i32, i32) {
    %c0_i32 = arith.constant 0 : i32
    %c0_i32_0 = arith.constant 0 : i32
    %c0_i32_1 = arith.constant 0 : i32
    return %c0_i32, %c0_i32_0 : i32, i32
  }
  func.func @transform_5(%arg0: i32) -> (i32, i32) {
    %c0_i32 = arith.constant 0 : i32
    %c0_i32_0 = arith.constant 0 : i32
    %c0_i32_1 = arith.constant 0 : i32
    return %c0_i32, %c0_i32_0 : i32, i32
  }
  func.func @transform_6(%arg0: i32) -> (i32, i32) {
    %c0_i32 = arith.constant 0 : i32
    %c0_i32_0 = arith.constant 0 : i32
    %c0_i32_1 = arith.constant 0 : i32
    return %c0_i32, %c0_i32_0 : i32, i32
  }
  func.func @transform_7(%arg0: i32) -> (i32, i32) {
    %c0_i32 = arith.constant 0 : i32
    %c0_i32_0 = arith.constant 0 : i32
    %c0_i32_1 = arith.constant 0 : i32
    return %c0_i32, %c0_i32_0 : i32, i32
  }
  func.func @transform_8(%arg0: i32) -> (i32, i32) {
    %c0_i32 = arith.constant 0 : i32
    %c0_i32_0 = arith.constant 0 : i32
    %c0_i32_1 = arith.constant 0 : i32
    return %c0_i32, %c0_i32_0 : i32, i32
  }
  func.func @transform_9(%arg0: i32) -> (i32, i32, i32) {
    %c0_i32 = arith.constant 0 : i32
    %c0_i32_0 = arith.constant 0 : i32
    %c0_i32_1 = arith.constant 0 : i32
    return %arg0, %c0_i32, %c0_i32_0 : i32, i32, i32
  }
}

</mosaic_0001>

<bundles_post_ra>
// kernel: tile.103
= control target key start
LH: loop header
LB: loop body
LE: loop exit
PB: predicated region body
PF: predicated region fallthrough
CT: control target
= control target key end

     0   :  { %s28_s0 = inlined_call_operand.vmem [shape: f32[8], index: 0, kind: input, shape index: {}]   ;;  %s29_s1 = inlined_call_operand.vmem [shape: f32[16,8], index: 1, kind: output, shape index: {}]  }
   0x1   :  { %v4_v0 = vld [vmem:[%s28_s0] ss:$0 sm:$0xff] }
   0x2   :  { %5 = vst [vmem:[%s29_s1] sm:$0xff] %v4_v0 }
   0x3   :  { %8 = vst [vmem:[%s29_s1 + $0x8] sm:$0xff] %v4_v0 }

// kernel: tile.104
= control target key start
LH: loop header
LB: loop body
LE: loop exit
PB: predicated region body
PF: predicated region fallthrough
CT: control target
= control target key end

     0   :  { %s131_s10 = smov 120   ;;  %s132_s11 = smov 104   ;;  %vm3_vm0 = vcmask 64512   ;;  %vm9_vm1 = vcmask 1048512   ;;  %vm15_vm2 = vcmask 982912   ;;  %vm21_vm3 = vcmask 917312   ;;  %s207_s0 = inlined_call_operand.vmem [shape: f32[16,8], index: 0, kind: input, shape index: {}]   ;;  %s208_s1 = inlined_call_operand.vmem [shape: f32[1,128], index: 1, kind: output, shape index: {}]  }
   0x1   :  { %v101_v0 = vld [vmem:[%s207_s0 + $0xf] sm:$0x1]   ;;  %v103_v1 = vld [vmem:[%s207_s0 + $0xd] sm:$0x1]   ;;  %v105_v2 = vld [vmem:[%s207_s0 + $0xb] sm:$0x1]  }
   0x2   :  { %7 = vrot.lane.b32.xlu0 %v101_v0, %s131_s10  ;;  %19 = vrot.lane.b32.xlu1 %v103_v1, %s132_s11  ;;  %s133_s14 = smov 88   ;;  %v102_v3 = vld [vmem:[%s207_s0 + $0xe] sm:$0x1]   ;;  %v104_v4 = vld [vmem:[%s207_s0 + $0xc] sm:$0x1]   ;;  %s134_s19 = smov 112  }
   0x3   :  { %31 = vrot.lane.b32.xlu2 %v105_v2, %s133_s14  ;;  %s135_s20 = smov 96   ;;  %v106_v5 = vld [vmem:[%s207_s0 + $0xa] sm:$0x1]   ;;  %s136_s23 = smov 80   ;;  %v107_v6 = vld [vmem:[%s207_s0 + $0x9] sm:$0x1]  }
   0x4   :  { %v108_v7 = vld [vmem:[%s207_s0 + $0x8] sm:$0x1]   ;;  %s137_s28 = smov 72   ;;  %s138_s29 = smov 64   ;;  %v109_v8 = vld [vmem:[%s207_s0 + $0x7] sm:$0x1]  }
   0x5   :  { %s139_s3 = smov 56   ;;  %v110_v9 = vld [vmem:[%s207_s0 + $0x6] sm:$0x1]   ;;  %v111_v10 = vld [vmem:[%s207_s0 + $0x5] sm:$0x1]   ;;  %s140_s8 = smov 48  }
   0x6   :  { %s141_s9 = smov 40   ;;  %v112_v11 = vld [vmem:[%s207_s0 + $0x4] sm:$0x1]   ;;  %s142_s12 = smov 32   ;;  %v113_v12 = vld [vmem:[%s207_s0 + $0x3] sm:$0x1]  }
   0x7   :  { %v114_v13 = vld [vmem:[%s207_s0 + $0x2] sm:$0x1]   ;;  %s143_s17 = smov 24   ;;  %s144_s18 = smov 16   ;;  %v115_v14 = vld [vmem:[%s207_s0 + $0x1] sm:$0x1]  }
   0x8   :  { %s145_s21 = smov 8   ;;  %v2_v15 = vld [vmem:[%s207_s0] sm:$0x1]   ;;  %vm27_vm4 = vcmask 851712   ;;  %vm33_vm5 = vcmask 786112   ;;  %vm39_vm6 = vcmask 720512  }
   0x9   :  { %4 = vst.msk [vmem:[#allocation0] sm:$0x1] %vm3_vm0, %v2_v15   ;;  %vm45_vm7 = vcmask 654912   ;;  %vm51_vm8 = vcmask 589312   ;;  %vm57_vm9 = vcmask 523712   ;;  %vm63_vm10 = vcmask 458112  }
   0xa   :  { %13 = vrot.lane.b32.xlu0 %v102_v3, %s134_s19  ;;  %25 = vrot.lane.b32.xlu1 %v104_v4, %s135_s20  ;;  %vm69_vm11 = vcmask 392512   ;;  %vm75_vm12 = vcmask 326912   ;;  %vm81_vm13 = vcmask 261312   ;;  %vm87_vm14 = vcmask 195712  }
   0xb   :  { %37 = vrot.lane.b32.xlu2 %v106_v5, %s136_s23  ;;  %vm93_vm15 = vcmask 130112  }
  0x12   :  { %43 = vrot.lane.b32.xlu0 %v107_v6, %s137_s28  ;;  %49 = vrot.lane.b32.xlu1 %v108_v7, %s138_s29 }
  0x13   :  { %55 = vrot.lane.b32.xlu2 %v109_v8, %s139_s3 }
  0x1a   :  { %61 = vrot.lane.b32.xlu0 %v110_v9, %s140_s8  ;;  %67 = vrot.lane.b32.xlu1 %v111_v10, %s141_s9 }
  0x1b   :  { %73 = vrot.lane.b32.xlu2 %v112_v11, %s142_s12 }
  0x22   :  { %79 = vrot.lane.b32.xlu0 %v113_v12, %s143_s17  ;;  %85 = vrot.lane.b32.xlu1 %v114_v13, %s144_s18 }
  0x23   :  { %91 = vrot.lane.b32.xlu2 %v115_v14, %s145_s21 }
  0x5d   :  { %v32_v16 = vpop.permute.xlu2 %31  }
  0x65   :  { %v38_v17 = vpop.permute.xlu2 %37  }
  0x6d   :  { %v56_v18 = vpop.permute.xlu2 %55  }
  0x74   :  { %v8_v19 = vpop.permute.xlu0 %7   ;;  %v20_v20 = vpop.permute.xlu1 %19  }
  0x75   :  { %10 = vst.msk [vmem:[#allocation0] sm:$0x1] %vm9_vm1, %v8_v19   ;;  %v74_v21 = vpop.permute.xlu2 %73  }
  0x7c   :  { %v14_v22 = vpop.permute.xlu0 %13   ;;  %v26_v23 = vpop.permute.xlu1 %25  }
  0x7d   :  { %16 = vst.msk [vmem:[#allocation0] sm:$0x1] %vm15_vm2, %v14_v22   ;;  %v92_v24 = vpop.permute.xlu2 %91  }
  0x7e   :  { %22 = vst.msk [vmem:[#allocation0] sm:$0x1] %vm21_vm3, %v20_v20  }
  0x7f   :  { %28 = vst.msk [vmem:[#allocation0] sm:$0x1] %vm27_vm4, %v26_v23  }
  0x80   :  { %34 = vst.msk [vmem:[#allocation0] sm:$0x1] %vm33_vm5, %v32_v16  }
  0x81   :  { %40 = vst.msk [vmem:[#allocation0] sm:$0x1] %vm39_vm6, %v38_v17  }
  0x84   :  { %v44_v25 = vpop.permute.xlu0 %43   ;;  %v50_v26 = vpop.permute.xlu1 %49  }
  0x85   :  { %46 = vst.msk [vmem:[#allocation0] sm:$0x1] %vm45_vm7, %v44_v25  }
  0x86   :  { %52 = vst.msk [vmem:[#allocation0] sm:$0x1] %vm51_vm8, %v50_v26  }
  0x87   :  { %58 = vst.msk [vmem:[#allocation0] sm:$0x1] %vm57_vm9, %v56_v18  }
  0x8c   :  { %v62_v27 = vpop.permute.xlu0 %61   ;;  %v68_v28 = vpop.permute.xlu1 %67  }
  0x8d   :  { %64 = vst.msk [vmem:[#allocation0] sm:$0x1] %vm63_vm10, %v62_v27  }
  0x8e   :  { %70 = vst.msk [vmem:[#allocation0] sm:$0x1] %vm69_vm11, %v68_v28  }
  0x8f   :  { %76 = vst.msk [vmem:[#allocation0] sm:$0x1] %vm75_vm12, %v74_v21  }
  0x94   :  { %v80_v29 = vpop.permute.xlu0 %79   ;;  %v86_v30 = vpop.permute.xlu1 %85  }
  0x95   :  { %82 = vst.msk [vmem:[#allocation0] sm:$0x1] %vm81_vm13, %v80_v29  }
  0x96   :  { %88 = vst.msk [vmem:[#allocation0] sm:$0x1] %vm87_vm14, %v86_v30  }
  0x97   :  { %94 = vst.msk [vmem:[#allocation0] sm:$0x1] %vm93_vm15, %v92_v24  }
  0x9e   :  { %v97_v31 = vld [vmem:[#allocation0] sm:$0x1] }
  0x9f   :  { %100 = vst [vmem:[%s208_s1] sm:$0x1] %v97_v31 }

// kernel: resnet_full_forward.1
= control target key start
LH: loop header
LB: loop body
LE: loop exit
PB: predicated region body
PF: predicated region fallthrough
CT: control target
= control target key end

     0   :  { %14 = vsyncpa [#allocation5], 0  ;;  %s2344_s0 = inlined_call_operand.vmem [shape: f32[2,64,64], index: 0, kind: input, shape index: {}]   ;;  %s2345_s1 = inlined_call_operand.vmem [shape: bf16[192,128], index: 1, kind: input, shape index: {}]   ;;  %s2346_s2 = inlined_call_operand.vmem [shape: f32[1,128], index: 2, kind: input, shape index: {}]   ;;  %s2347_s3 = inlined_call_operand.vmem [shape: bf16[384,128], index: 3, kind: input, shape index: {}]   ;;  %s2348_s4 = inlined_call_operand.vmem [shape: f32[1,128], index: 4, kind: input, shape index: {}]   ;;  %s2349_s5 = inlined_call_operand.vmem [shape: bf16[384,128], index: 5, kind: input, shape index: {}]   ;;  %s2350_s6 = inlined_call_operand.vmem [shape: f32[1,128], index: 6, kind: input, shape index: {}]   ;;  %s2351_s7 = inlined_call_operand.vmem [shape: f32[128,128], index: 7, kind: input, shape index: {}]   ;;  %s2352_s8 = inlined_call_operand.vmem [shape: f32[1,128], index: 8, kind: input, shape index: {}]   ;;  %s2353_s9 = inlined_call_operand.hbm [shape: f32[2,1,128], index: 9, kind: output, shape index: {}]  }
   0x1   :  { %16 = vsyncpa [#allocation5 + $0x1], 0  ;;  %s1913_s30 = smov 0   ;;  %s1915_s10 = smov 0  }
   0x2   :  { %s1917_s11 = smov 0   ;;  %s1919_s12 = smov 0  }
   0x3 LB: > { %s1934_s13 = sadd.s32 4294967295, %s1859_s12   ;;  %s1420_s14 = sadd.s32 4294967294, %s1859_s12   ;;  %s1859_s12 = sphi %s1919_s12, %s2359_s12   ;;  %s1855_s11 = sphi %s1917_s11, %s2358_s11   ;;  %s1851_s10 = sphi %s1915_s10, %s2357_s10   ;;  %s1847_s30 = sphi %s1913_s30, %s2356_s30  }
   0x4   : > { %s1938_s15 = sadd.s32 1, %s1859_s12   ;;  %s223_s16 = sadd.s32 1, %s1855_s11 }
   0x5   : > { %s220_s17 = ssub.s32 %s1859_s12, %s1938_s15  ;;  %p233_p0 = scmp.ne.s32.totalorder %s1855_s11, %s1851_s10 }
   0x6   : > { %p221_p1 = scmp.eq.s32.totalorder %s220_s17, 0  ;;  %p234_p2 = scmp.eq.s32.totalorder %s1934_s13, 1 }
   0x7   : > { %p239_p3 = scmp.ne.s32.totalorder %s1851_s10, %s1847_s30  ;;  %p240_p4 = scmp.eq.s32.totalorder %s1420_s14, 1 }
   0x8   : > { %s1949_s18 = scalar_select %p221_p1, %s1855_s11, %s223_s16  }
   0x9   : > { %p1951_p5 = por %p234_p2, %p233_p0  ;;  %p1955_p6 = por %p240_p4, %p239_p3 }
   0xa   : > { %p1423_p7 = scmp.ge.s32.totalorder %s1859_s12, 1  ;;  %p290_p8 = scmp.lt.s32.totalorder %s1859_s12, 3 }
   0xc   : > { %p291_p9 = pnand %p1423_p7, %p290_p8 }
   0xd   : > { %p325_p10 = scmp.lt.s32.totalorder (!%p291_p9), %s1934_s13, 1  ;;  %s1862_s14 = smov (!%p291_p9), 64  }
   0xe   : > { %294 = sbr.rel (%p291_p9) target bundleno = 809 (0x329), region = 56  ;;  %s323_s16 = sand.u32 (!%p291_p9), 1, %s1851_s10  }
   0xf   : > { %s1353_s28 = scalar_lea.sflag (!%p291_p9), [#allocation5], %s323_s16 }
  0x13   : > { %vm331_vm0 = vcmask 523264   ;;  %vm334_vm1 = vcmask 517120   ;;  %v1861_v0 = vmov 0.0   ;;  %s326_s21 = scalar_select %p325_p10, %s1934_s13, 1  ;;  %v1680_v6 = vld [vmem:[%s2345_s1 + $0x38] sm:$0xff]  ;;  %v1679_v8 = vld [vmem:[%s2345_s1 + $0x30] sm:$0xff] }
  0x14   : > { %332 = vst.msk [vmem:[#allocation2] sm:$0xff] %vm331_vm0, %v1861_v0  ;;  %v1684_v7 = vld [vmem:[%s2345_s1 + $0x58] sm:$0xff]  ;;  %557 = vmatpush.bf16.msra.mxu0 %v1680_v6  ;;  %v1683_v9 = vld [vmem:[%s2345_s1 + $0x50] sm:$0xff]  ;;  %v1678_v10 = vld [vmem:[%s2345_s1 + $0x28] sm:$0xff] }
  0x15   : > { %333 = vst.msk [vmem:[#allocation2 + $0x8] sm:$0xff] %vm331_vm0, %v1861_v0  ;;  %s1672_s22 = sshll.u32 %s326_s21, 6  ;;  %590 = vmatpush.bf16.msra.mxu1 %v1684_v7  ;;  %v1682_v11 = vld [vmem:[%s2345_s1 + $0x48] sm:$0xff]  ;;  %v1677_v16 = vld [vmem:[%s2345_s1 + $0x20] sm:$0xff]  ;;  %v1676_v22 = vld [vmem:[%s2345_s1 + $0x18] sm:$0xff]  ;;  %s1817_s21 = scalar_lea.hbm %s2353_s9, 2 }
  0x16   : > { %335 = vst.msk [vmem:[#allocation2 + $0x10] sm:$0x3] %vm334_vm1, %v1861_v0  ;;  %s1970_s25 = scalar_lea.vmem %s2344_s0, %s1672_s22  ;;  %v1681_v17 = vld [vmem:[%s2345_s1 + $0x40] sm:$0xff]  ;;  %v1675_v25 = vld [vmem:[%s2345_s1 + $0x10] sm:$0xff]  ;;  %v1674_v31 = vld [vmem:[%s2345_s1 + $0x8] sm:$0xff]  ;;  %s1361_s22 = scalar_lea.hbm %s2353_s9, %s1934_s13 }
  0x17   : > { %336 = vst.msk [vmem:[#allocation2 + $0x18] sm:$0xff] %vm331_vm0, %v1861_v0  ;;  %v357_v1 = vld [vmem:[%s1970_s25] sm:$0xff]  ;;  %v358_v2 = vld [vmem:[%s1970_s25 + $0x8] sm:$0xff]  ;;  %v359_v12 = vld [vmem:[%s1970_s25 + $0x10] sm:$0xff]  ;;  %s1365_s27 = sshll.u32 %s1361_s22, 4  ;;  %s1366_s27 = int_to_ptr.hbm [resolvable:$true] %s1365_s27 }
  0x18   : > { %337 = vst.msk [vmem:[#allocation2 + $0x20] sm:$0xff] %vm331_vm0, %v1861_v0  ;;  %558 = vmatpush.bf16.msra.mxu0 %v1679_v8  ;;  %v360_v13 = vld [vmem:[%s1970_s25 + $0x18] sm:$0xff]  ;;  %v361_v14 = vld [vmem:[%s1970_s25 + $0x20] sm:$0xff]  ;;  %v362_v15 = vld [vmem:[%s1970_s25 + $0x28] sm:$0xff] }
  0x19   : > { %338 = vst.msk [vmem:[#allocation2 + $0x28] sm:$0x3] %vm334_vm1, %v1861_v0  ;;  %591 = vmatpush.bf16.msra.mxu1 %v1683_v9  ;;  %v363_v20 = vld [vmem:[%s1970_s25 + $0x30] sm:$0xff]  ;;  %v364_v21 = vld [vmem:[%s1970_s25 + $0x38] sm:$0xff]  ;;  %v1673_v35 = vld [vmem:[%s2345_s1] sm:$0xff]  ;;  %s324_s25 = scalar_lea.vmem [#allocation4], %s323_s16 }
  0x1a   : > { %365 = vst.msk [vmem:[#allocation2 + $0x1] sm:$0xff] %vm331_vm0, %v357_v1  ;;  %v1708_v61 = vld [vmem:[%s2347_s3 + $0xb8] sm:$0xff]  ;;  %v1707_v1 = vld [vmem:[%s2347_s3 + $0xb0] sm:$0xff]  ;;  %v1706_v8 = vld [vmem:[%s2347_s3 + $0xa8] sm:$0xff]  ;;  %s1363_s26 = sshll.u32 %s324_s25, 4  ;;  %s1364_s26 = int_to_ptr.vmem [resolvable:$true] %s1363_s26 }
  0x1b   : > { %366 = vst.msk [vmem:[#allocation2 + $0x9] sm:$0xff] %vm331_vm0, %v358_v2  ;;  %v1692_v62 = vld [vmem:[%s2347_s3 + $0x38] sm:$0xff]  ;;  %v1691_v2 = vld [vmem:[%s2347_s3 + $0x30] sm:$0xff] }
  0x1c   : > { %339 = vst.msk [vmem:[#allocation2 + $0x30] sm:$0xff] %vm331_vm0, %v1861_v0  ;;  %559 = vmatpush.bf16.msra.mxu0 %v1678_v10  ;;  %v1700_v63 = vld [vmem:[%s2347_s3 + $0x78] sm:$0xff]  ;;  %863 = vmatpush.bf16.msra.mxu2 %v1692_v62 }
  0x1d   : > { %340 = vst.msk [vmem:[#allocation2 + $0x38] sm:$0xff] %vm331_vm0, %v1861_v0  ;;  %592 = vmatpush.bf16.msra.mxu1 %v1682_v11  ;;  %892 = vmatpush.bf16.msra.mxu3 %v1700_v63  ;;  %v1705_v11 = vld [vmem:[%s2347_s3 + $0xa0] sm:$0xff] }
  0x1e   : > { %341 = vst.msk [vmem:[#allocation2 + $0x40] sm:$0x3] %vm334_vm1, %v1861_v0 }
  0x1f   : > { %342 = vst.msk [vmem:[#allocation2 + $0x48] sm:$0xff] %vm331_vm0, %v1861_v0 }
  0x20   : > { %343 = vst.msk [vmem:[#allocation2 + $0x50] sm:$0xff] %vm331_vm0, %v1861_v0  ;;  %560 = vmatpush.bf16.msra.mxu0 %v1677_v16  ;;  %864 = vmatpush.bf16.msra.mxu2 %v1691_v2 }
  0x21   : > { %v381_v3 = vld [vmem:[#allocation2 + $0x1] sm:$0xff]  ;;  %344 = vst.msk [vmem:[#allocation2 + $0x58] sm:$0x3] %vm334_vm1, %v1861_v0  ;;  %593 = vmatpush.bf16.msra.mxu1 %v1681_v17 }
  0x22   : > { %v382_v4 = vld [vmem:[#allocation2 + $0x9] sm:$0xff]  ;;  %345 = vst [vmem:[#allocation3] sm:$0xff] %v1861_v0  ;;  %v373_v43 = vld [vmem:[#allocation2] sm:$0xff] }
  0x23   : > { %v1774_v5 = vpack.i.bf16 %v382_v4, %v381_v3  ;;  %346 = vst [vmem:[#allocation3 + $0x8] sm:$0xff] %v1861_v0  ;;  %v389_v18 = vld [vmem:[#allocation2 + $0x2] sm:$0xff]  ;;  %v390_v19 = vld [vmem:[#allocation2 + $0xa] sm:$0xff] }
  0x24   : > { %347 = vst [vmem:[#allocation3 + $0x10] sm:$0x3] %v1861_v0  ;;  %v438_v23 = vpack.c.bf16 %v390_v19, %v389_v18  ;;  %561 = vmatpush.bf16.msra.mxu0 %v1676_v22  ;;  %v374_v44 = vld [vmem:[#allocation2 + $0x8] sm:$0xff]  ;;  %v1699_v3 = vld [vmem:[%s2347_s3 + $0x70] sm:$0xff]  ;;  %v1697_v22 = vld [vmem:[%s2347_s3 + $0x60] sm:$0xff] }
  0x25   : > { %1775 = vrot.lane.b32.xlu0 %v1774_v5, %s1862_s14  ;;  %348 = vst [vmem:[#allocation3 + $0x18] sm:$0xff] %v1861_v0  ;;  %921 = vmatpush.bf16.msrb.mxu1 %v1708_v61 }
  0x26   : > { %349 = vst [vmem:[#allocation3 + $0x20] sm:$0xff] %v1861_v0  ;;  %1474 = vmatmul.msk.bf16.vlgmr.msra.gmra.mxu1 %vm331_vm0, %v438_v23  ;;  %893 = vmatpush.bf16.msra.mxu3 %v1699_v3  ;;  %v1690_v23 = vld [vmem:[%s2347_s3 + $0x28] sm:$0xff] }
  0x27   : > { %350 = vst [vmem:[#allocation3 + $0x28] sm:$0x3] %v1861_v0  ;;  %865 = vmatpush.bf16.msra.mxu2 %v1690_v23 }
  0x28   : > { %351 = vst [vmem:[#allocation3 + $0x30] sm:$0xff] %v1861_v0  ;;  %562 = vmatpush.bf16.msra.mxu0 %v1675_v25  ;;  %v1704_v25 = vld [vmem:[%s2347_s3 + $0x98] sm:$0xff] }
  0x29   : > { %352 = vst [vmem:[#allocation3 + $0x38] sm:$0xff] %v1861_v0  ;;  %922 = vmatpush.bf16.msrb.mxu1 %v1707_v1 }
  0x2a   : > { %353 = vst [vmem:[#allocation3 + $0x40] sm:$0x3] %v1861_v0 }
  0x2b   : > { %354 = vst [vmem:[#allocation3 + $0x48] sm:$0xff] %v1861_v0 }
  0x2c   : > { %355 = vst [vmem:[#allocation3 + $0x50] sm:$0xff] %v1861_v0  ;;  %563 = vmatpush.bf16.msra.mxu0 %v1674_v31  ;;  %v1687_v31 = vld [vmem:[%s2347_s3 + $0x10] sm:$0xff] }
  0x2d   : > { %356 = vst [vmem:[#allocation3 + $0x58] sm:$0x3] %v1861_v0  ;;  %923 = vmatpush.bf16.msrb.mxu1 %v1706_v8 }
  0x2e   : > { %367 = vst.msk [vmem:[#allocation2 + $0x19] sm:$0xff] %vm331_vm0, %v359_v12 }
  0x2f   : > { %368 = vst.msk [vmem:[#allocation2 + $0x21] sm:$0xff] %vm331_vm0, %v360_v13 }
  0x30   : > { %369 = vst.msk [vmem:[#allocation2 + $0x31] sm:$0xff] %vm331_vm0, %v361_v14  ;;  %564 = vmatpush.bf16.msra.mxu0 %v1673_v35 }
  0x31   : > { %370 = vst.msk [vmem:[#allocation2 + $0x39] sm:$0xff] %vm331_vm0, %v362_v15  ;;  %924 = vmatpush.bf16.msrb.mxu1 %v1705_v11 }
  0x32   : > { %371 = vst.msk [vmem:[#allocation2 + $0x49] sm:$0xff] %vm331_vm0, %v363_v20 }
  0x33   : > { %372 = vst.msk [vmem:[#allocation2 + $0x51] sm:$0xff] %vm331_vm0, %v364_v21  ;;  %v1698_v21 = vld [vmem:[%s2347_s3 + $0x68] sm:$0xff] }
  0x34   : > { %894 = vmatpush.bf16.msra.mxu3 %v1698_v21  ;;  %v1731_v21 = vld [vmem:[%s2349_s5 + $0xb0] sm:$0xff] }
  0x35   : > { %v383_v24 = vld [vmem:[#allocation2 + $0x19] sm:$0xff]  ;;  %925 = vmatpush.bf16.msrb.mxu1 %v1704_v25  ;;  %v1722_v25 = vld [vmem:[%s2349_s5 + $0x68] sm:$0xff] }
  0x36   : > { %v384_v26 = vld [vmem:[#allocation2 + $0x21] sm:$0xff]  ;;  %v375_v54 = vld [vmem:[#allocation2 + $0x18] sm:$0xff] }
  0x37   : > { %v1779_v27 = vpack.i.bf16 %v384_v26, %v383_v24  ;;  %v385_v28 = vld [vmem:[#allocation2 + $0x31] sm:$0xff]  ;;  %v391_v36 = vld [vmem:[#allocation2 + $0x1a] sm:$0xff]  ;;  %v392_v37 = vld [vmem:[#allocation2 + $0x22] sm:$0xff] }
  0x38   : > { %v386_v29 = vld [vmem:[#allocation2 + $0x39] sm:$0xff]  ;;  %v440_v38 = vpack.c.bf16 %v392_v37, %v391_v36  ;;  %v377_v6 = vld [vmem:[#allocation2 + $0x30] sm:$0xff]  ;;  %895 = vmatpush.bf16.msra.mxu3 %v1697_v22 }
  0x39   : > { %1780 = vrot.lane.b32.xlu0 %v1779_v27, %s1862_s14  ;;  %v1784_v30 = vpack.i.bf16 %v386_v29, %v385_v28  ;;  %v387_v32 = vld [vmem:[#allocation2 + $0x49] sm:$0xff]  ;;  %v393_v39 = vld [vmem:[#allocation2 + $0x32] sm:$0xff]  ;;  %v394_v40 = vld [vmem:[#allocation2 + $0x3a] sm:$0xff] }
  0x3a   : > { %v388_v33 = vld [vmem:[#allocation2 + $0x51] sm:$0xff]  ;;  %1475 = vmatmul.msk.bf16.gmra.mxu1 %vm331_vm0, %v440_v38  ;;  %v442_v41 = vpack.c.bf16 %v394_v40, %v393_v39  ;;  %v376_v55 = vld [vmem:[#allocation2 + $0x20] sm:$0xff]  ;;  %v379_v16 = vld [vmem:[#allocation2 + $0x48] sm:$0xff] }
  0x3b   : > { %1785 = vrot.lane.b32.xlu1 %v1784_v30, %s1862_s14  ;;  %v1789_v34 = vpack.i.bf16 %v388_v33, %v387_v32  ;;  %v395_v50 = vld [vmem:[#allocation2 + $0x4a] sm:$0xff]  ;;  %v396_v51 = vld [vmem:[#allocation2 + $0x52] sm:$0xff]  ;;  %v1689_v26 = vld [vmem:[%s2347_s3 + $0x20] sm:$0xff] }
  0x3c   : > { %v444_v52 = vpack.c.bf16 %v396_v51, %v395_v50  ;;  %v378_v7 = vld [vmem:[#allocation2 + $0x38] sm:$0xff]  ;;  %v380_v17 = vld [vmem:[#allocation2 + $0x50] sm:$0xff]  ;;  %866 = vmatpush.bf16.msra.mxu2 %v1689_v26  ;;  %v1694_v29 = vld [vmem:[%s2347_s3 + $0x48] sm:$0xff] }
  0x3d   : > { %v1696_v24 = vld [vmem:[%s2347_s3 + $0x58] sm:$0xff]  ;;  %v1695_v27 = vld [vmem:[%s2347_s3 + $0x50] sm:$0xff]  ;;  %v1693_v32 = vld [vmem:[%s2347_s3 + $0x40] sm:$0xff] }
  0x3e   : > { %896 = vmatpush.bf16.msra.mxu3 %v1696_v24  ;;  %v1688_v28 = vld [vmem:[%s2347_s3 + $0x18] sm:$0xff]  ;;  %v1703_v30 = vld [vmem:[%s2347_s3 + $0x90] sm:$0xff]  ;;  %v1686_v33 = vld [vmem:[%s2347_s3 + $0x8] sm:$0xff] }
  0x3f   : > { %926 = vmatpush.bf16.msrb.mxu1 %v1703_v30  ;;  %v1685_v36 = vld [vmem:[%s2347_s3] sm:$0xff]  ;;  %v1715_v22 = vld [vmem:[%s2349_s5 + $0x30] sm:$0xff]  ;;  %v1730_v26 = vld [vmem:[%s2349_s5 + $0xa8] sm:$0xff] }
  0x40   : > { %867 = vmatpush.bf16.msra.mxu2 %v1688_v28  ;;  %v1701_v37 = vld [vmem:[%s2347_s3 + $0x80] sm:$0xff] }
  0x41   : > { %v2123_v38 = vld [vmem:[%s2346_s2] ss:$0 sm:$0xff] }
  0x42   : > { %897 = vmatpush.bf16.msra.mxu3 %v1695_v27 }
  0x43   : > { %1790 = vrot.lane.b32.xlu1 %v1789_v34, %s1862_s14  ;;  %v1702_v34 = vld [vmem:[%s2347_s3 + $0x88] sm:$0xff]  ;;  %s1811_s14 = sshra.s32 %s1366_s27, 4  ;;  %s1812_s14 = int_to_ptr.hbm [resolvable:$true] %s1811_s14 }
  0x44   : > { %868 = vmatpush.bf16.msra.mxu2 %v1687_v31  ;;  %927 = vmatpush.bf16.msrb.mxu1 %v1702_v34  ;;  %v1713_v34 = vld [vmem:[%s2349_s5 + $0x20] sm:$0xff]  ;;  %s1813_s29 = scalar_lea.hbm %s1812_s14, 1  ;;  %p1818_p0 = scmp.lt.s32.totalorder %s1812_s14, %s2353_s9 }
  0x45   : > { %p1814_p11 = scmp.ne.s32.totalorder %s1812_s14, %s1813_s29  ;;  %p1819_p1 = scmp.lt.s32.totalorder %s1817_s21, %s1813_s29 }
  0x46   : > { %898 = vmatpush.bf16.msra.mxu3 %v1694_v29  ;;  %v1714_v29 = vld [vmem:[%s2349_s5 + $0x28] sm:$0xff] }
  0x47   : > { %p1815_p12 = pnand %p1814_p11, %p1951_p5  ;;  %p1820_p2 = por %p1819_p1, %p1818_p0 }
  0x48   : > { %869 = vmatpush.bf16.msra.mxu2 %v1686_v33  ;;  %928 = vmatpush.bf16.msrb.mxu1 %v1701_v37  ;;  %v1729_v33 = vld [vmem:[%s2349_s5 + $0xa0] sm:$0xff] }
  0x49   : > { %p1816_p13 = pneg %p1815_p12 }
  0x4a   : > { %1476 = vmatmul.msk.bf16.gmra.mxu1 %vm331_vm0, %v442_v41  ;;  %899 = vmatpush.bf16.msra.mxu3 %v1693_v32  ;;  %v1721_v32 = vld [vmem:[%s2349_s5 + $0x60] sm:$0xff] }
  0x4b   : > { %p1821_p3 = pnand %p1820_p2, %p1816_p13 }
  0x4c   : > { %870 = vmatpush.bf16.msra.mxu2 %v1685_v36 }
  0x5a   : > { %1477 = vmatmul.msk.bf16.gmra.mxu1 %vm331_vm0, %v444_v52 }
  0x97   : > { %v1776_v42 = vpop.permute.xlu0 %1775 }
  0x98   : > { %v1778_v45 = vunpack.i.h.bf16 %v1776_v42  ;;  %v1777_v46 = vunpack.i.l.bf16 %v1776_v42 }
  0x9a   : > { %v429_v47 = vsel %vm331_vm0, %v373_v43, %v1777_v46  ;;  %v430_v48 = vsel %vm331_vm0, %v374_v44, %v1778_v45 }
  0x9b   : > { %v437_v49 = vpack.c.bf16 %v430_v48, %v429_v47 }
  0x9d   : > { %565 = vmatmul.bf16.vlgmr.msra.gmra.mxu0 %v437_v49 }
  0xa3   : > { %v595_v35 = vpop.f32.mrf.mxu1 }
  0xab   : > { %v1781_v53 = vpop.permute.xlu0 %1780  ;;  %v597_v41 = vpop.f32.mrf.mxu1 }
  0xac   : > { %v1783_v56 = vunpack.i.h.bf16 %v1781_v53  ;;  %v1782_v57 = vunpack.i.l.bf16 %v1781_v53 }
  0xad   : > { %v1786_v0 = vpop.permute.xlu1 %1785 }
  0xae   : > { %v431_v58 = vsel %vm331_vm0, %v375_v54, %v1782_v57  ;;  %v432_v59 = vsel %vm331_vm0, %v376_v55, %v1783_v56  ;;  %v1788_v4 = vunpack.i.h.bf16 %v1786_v0  ;;  %v1787_v5 = vunpack.i.l.bf16 %v1786_v0 }
  0xaf   : > { %v439_v60 = vpack.c.bf16 %v432_v59, %v431_v58 }
  0xb0   : > { %v433_v9 = vsel %vm331_vm0, %v377_v6, %v1787_v5  ;;  %v434_v10 = vsel %vm331_vm0, %v378_v7, %v1788_v4 }
  0xb1   : > { %570 = vmatmul.bf16.gmra.mxu0 %v439_v60  ;;  %v441_v12 = vpack.c.bf16 %v434_v10, %v433_v9 }
  0xb5   : > { %v1791_v13 = vpop.permute.xlu1 %1790 }
  0xb6   : > { %v1793_v14 = vunpack.i.h.bf16 %v1791_v13  ;;  %v1792_v15 = vunpack.i.l.bf16 %v1791_v13 }
  0xb7   : > { %v600_v47 = vpop.f32.mrf.mxu1 }
  0xb8   : > { %v435_v18 = vsel %vm331_vm0, %v379_v16, %v1792_v15  ;;  %v436_v19 = vsel %vm331_vm0, %v380_v17, %v1793_v14  ;;  %v1724_v16 = vld [vmem:[%s2349_s5 + $0x78] sm:$0xff] }
  0xb9   : > { %v443_v20 = vpack.c.bf16 %v436_v19, %v435_v18  ;;  %v1732_v17 = vld [vmem:[%s2349_s5 + $0xb8] sm:$0xff]  ;;  %1227 = vmatpush.bf16.msrb.mxu2 %v1724_v16 }
  0xba   : > { %v1716_v18 = vld [vmem:[%s2349_s5 + $0x38] sm:$0xff]  ;;  %1256 = vmatpush.bf16.msrb.mxu3 %v1732_v17 }
  0xbb   : > { %1198 = vmatpush.bf16.msrb.mxu0 %v1716_v18 }
  0xbe   : > { %1257 = vmatpush.bf16.msrb.mxu3 %v1731_v21 }
  0xbf   : > { %v602_v53 = vpop.f32.mrf.mxu1  ;;  %1199 = vmatpush.bf16.msrb.mxu0 %v1715_v22 }
  0xc1   : > { %575 = vmatmul.bf16.gmra.mxu0 %v441_v12 }
  0xc2   : > { %1258 = vmatpush.bf16.msrb.mxu3 %v1730_v26 }
  0xc3   : > { %1200 = vmatpush.bf16.msrb.mxu0 %v1714_v29 }
  0xc6   : > { %1259 = vmatpush.bf16.msrb.mxu3 %v1729_v33 }
  0xc7   : > { %v605_v0 = vpop.f32.mrf.mxu1  ;;  %1201 = vmatpush.bf16.msrb.mxu0 %v1713_v34 }
  0xcf   : > { %v607_v8 = vpop.f32.mrf.mxu1 }
  0xd1   : > { %580 = vmatmul.bf16.gmra.mxu0 %v443_v20  ;;  %v1723_v20 = vld [vmem:[%s2349_s5 + $0x70] sm:$0xff] }
  0xd2   : > { %1228 = vmatpush.bf16.msrb.mxu2 %v1723_v20 }
  0xd6   : > { %1229 = vmatpush.bf16.msrb.mxu2 %v1722_v25 }
  0xd7   : > { %v610_v27 = vpop.f32.mrf.mxu1 }
  0xda   : > { %1230 = vmatpush.bf16.msrb.mxu2 %v1721_v32 }
 0x11a   : > { %v566_v39 = vpop.f32.mrf.mxu0 }
 0x11b   : > { %v567_v40 = vadd.f32 %v2123_v38, %v566_v39 }
 0x11d   : > { %v596_v42 = vadd.f32 %v595_v35, %v567_v40 }
 0x11f   : > { %v2126_v43 = vmax.f32 %v596_v42, 0.0 }
 0x121   : > { %623 = vst [vmem:[#allocation3 + $0x1] sm:$0xff] %v2126_v43 }
 0x122   : > { %v568_v44 = vpop.f32.mrf.mxu0 }
 0x123   : > { %v569_v45 = vadd.f32 %v2123_v38, %v568_v44 }
 0x125   : > { %v598_v46 = vadd.f32 %v597_v41, %v569_v45 }
 0x127   : > { %v2130_v48 = vmax.f32 %v598_v46, 0.0  ;;  %v612_v46 = vpop.f32.mrf.mxu1 }
 0x128   : > { %v631_v52 = vld [vmem:[#allocation3] sm:$0xff] }
 0x129   : > { %624 = vst [vmem:[#allocation3 + $0x9] sm:$0xff] %v2130_v48  ;;  %v656_v49 = vpack.c.bf16 %v2130_v48, %v2126_v43 }
 0x12b   : > { %900 = vmatmul.bf16.vlgmr.msra.gmra.mxu3 %v656_v49 }
 0x12e   : > { %v571_v50 = vpop.f32.mrf.mxu0 }
 0x12f   : > { %v572_v51 = vadd.f32 %v2123_v38, %v571_v50 }
 0x130   : > { %v632_v54 = vld [vmem:[#allocation3 + $0x8] sm:$0xff] }
 0x131   : > { %v647_v55 = vld [vmem:[#allocation3 + $0x2] sm:$0xff]  ;;  %v648_v56 = vld [vmem:[#allocation3 + $0xa] sm:$0xff]  ;;  %v601_v57 = vadd.f32 %v600_v47, %v572_v51  ;;  %v655_v58 = vpack.c.bf16 %v632_v54, %v631_v52 }
 0x132   : > { %v657_v59 = vpack.c.bf16 %v648_v56, %v647_v55 }
 0x133   : > { %v2136_v60 = vmax.f32 %v601_v57, 0.0  ;;  %871 = vmatmul.bf16.vlgmr.msra.gmra.mxu2 %v655_v58  ;;  %v1728_v57 = vld [vmem:[%s2349_s5 + $0x98] sm:$0xff] }
 0x134   : > { %929 = vmatmul.bf16.vlgmr.msrb.gmra.mxu1 %v657_v59  ;;  %v1712_v58 = vld [vmem:[%s2349_s5 + $0x18] sm:$0xff]  ;;  %1260 = vmatpush.bf16.msrb.mxu3 %v1728_v57  ;;  %v1719_v59 = vld [vmem:[%s2349_s5 + $0x50] sm:$0xff] }
 0x135   : > { %625 = vst [vmem:[#allocation3 + $0x19] sm:$0xff] %v2136_v60  ;;  %1202 = vmatpush.bf16.msrb.mxu0 %v1712_v58 }
 0x136   : > { %v573_v61 = vpop.f32.mrf.mxu0 }
 0x137   : > { %v574_v62 = vadd.f32 %v2123_v38, %v573_v61  ;;  %v1727_v61 = vld [vmem:[%s2349_s5 + $0x90] sm:$0xff] }
 0x138   : > { %1261 = vmatpush.bf16.msrb.mxu3 %v1727_v61 }
 0x139   : > { %v603_v63 = vadd.f32 %v602_v53, %v574_v62  ;;  %v1711_v62 = vld [vmem:[%s2349_s5 + $0x10] sm:$0xff] }
 0x13a   : > { %1203 = vmatpush.bf16.msrb.mxu0 %v1711_v62 }
 0x13b   : > { %v2140_v1 = vmax.f32 %v603_v63, 0.0  ;;  %v1718_v63 = vld [vmem:[%s2349_s5 + $0x48] sm:$0xff] }
 0x13c   : > { %v633_v7 = vld [vmem:[#allocation3 + $0x18] sm:$0xff] }
 0x13d   : > { %626 = vst [vmem:[#allocation3 + $0x21] sm:$0xff] %v2140_v1  ;;  %v659_v2 = vpack.c.bf16 %v2140_v1, %v2136_v60 }
 0x13e   : > { %v576_v3 = vpop.f32.mrf.mxu0 }
 0x13f   : > { %v577_v4 = vadd.f32 %v2123_v38, %v576_v3  ;;  %905 = vmatmul.bf16.gmra.mxu3 %v659_v2  ;;  %v1710_v2 = vld [vmem:[%s2349_s5 + $0x8] sm:$0xff]  ;;  %v1717_v3 = vld [vmem:[%s2349_s5 + $0x40] sm:$0xff] }
 0x140   : > { %1204 = vmatpush.bf16.msrb.mxu0 %v1710_v2 }
 0x141   : > { %v606_v5 = vadd.f32 %v605_v0, %v577_v4  ;;  %v1726_v0 = vld [vmem:[%s2349_s5 + $0x88] sm:$0xff] }
 0x142   : > { %1262 = vmatpush.bf16.msrb.mxu3 %v1726_v0 }
 0x143   : > { %v2146_v6 = vmax.f32 %v606_v5, 0.0 }
 0x144   : > { %v634_v9 = vld [vmem:[#allocation3 + $0x20] sm:$0xff] }
 0x145   : > { %v649_v10 = vld [vmem:[#allocation3 + $0x1a] sm:$0xff]  ;;  %v650_v11 = vld [vmem:[#allocation3 + $0x22] sm:$0xff]  ;;  %627 = vst [vmem:[#allocation3 + $0x31] sm:$0xff] %v2146_v6  ;;  %v658_v12 = vpack.c.bf16 %v634_v9, %v633_v7 }
 0x146   : > { %v660_v13 = vpack.c.bf16 %v650_v11, %v649_v10  ;;  %v578_v14 = vpop.f32.mrf.mxu0  ;;  %v1725_v7 = vld [vmem:[%s2349_s5 + $0x80] sm:$0xff] }
 0x147   : > { %v579_v15 = vadd.f32 %v2123_v38, %v578_v14  ;;  %876 = vmatmul.bf16.gmra.mxu2 %v658_v12  ;;  %1263 = vmatpush.bf16.msrb.mxu3 %v1725_v7  ;;  %v2240_v9 = vld [vmem:[%s2348_s4] ss:$0 sm:$0xff] }
 0x148   : > { %934 = vmatmul.bf16.gmra.mxu1 %v660_v13 }
 0x149   : > { %v608_v19 = vadd.f32 %v607_v8, %v579_v15  ;;  %v1709_v8 = vld [vmem:[%s2349_s5] sm:$0xff] }
 0x14a   : > { %1205 = vmatpush.bf16.msrb.mxu0 %v1709_v8 }
 0x14b   : > { %v2168_v23 = vmax.f32 %v608_v19, 0.0 }
 0x14c   : > { %v635_v36 = vld [vmem:[#allocation3 + $0x30] sm:$0xff] }
 0x14d   : > { %628 = vst [vmem:[#allocation3 + $0x39] sm:$0xff] %v2168_v23  ;;  %v662_v24 = vpack.c.bf16 %v2168_v23, %v2146_v6 }
 0x14e   : > { %v581_v28 = vpop.f32.mrf.mxu0 }
 0x14f   : > { %v582_v30 = vadd.f32 %v2123_v38, %v581_v28  ;;  %910 = vmatmul.bf16.gmra.mxu3 %v662_v24 }
 0x151   : > { %v611_v31 = vadd.f32 %v610_v27, %v582_v30 }
 0x153   : > { %v2192_v35 = vmax.f32 %v611_v31, 0.0 }
 0x154   : > { %v636_v37 = vld [vmem:[#allocation3 + $0x38] sm:$0xff] }
 0x155   : > { %v651_v39 = vld [vmem:[#allocation3 + $0x32] sm:$0xff]  ;;  %v652_v40 = vld [vmem:[#allocation3 + $0x3a] sm:$0xff]  ;;  %629 = vst [vmem:[#allocation3 + $0x49] sm:$0xff] %v2192_v35  ;;  %v661_v41 = vpack.c.bf16 %v636_v37, %v635_v36 }
 0x156   : > { %v663_v42 = vpack.c.bf16 %v652_v40, %v651_v39  ;;  %v583_v44 = vpop.f32.mrf.mxu0 }
 0x157   : > { %v584_v45 = vadd.f32 %v2123_v38, %v583_v44  ;;  %881 = vmatmul.bf16.gmra.mxu2 %v661_v41  ;;  %v1720_v38 = vld [vmem:[%s2349_s5 + $0x58] sm:$0xff] }
 0x158   : > { %939 = vmatmul.bf16.gmra.mxu1 %v663_v42  ;;  %1231 = vmatpush.bf16.msrb.mxu2 %v1720_v38 }
 0x159   : > { %v613_v47 = vadd.f32 %v612_v46, %v584_v45 }
 0x15b   : > { %v2196_v49 = vmax.f32 %v613_v47, 0.0 }
 0x15c   : > { %v637_v51 = vld [vmem:[#allocation3 + $0x48] sm:$0xff]  ;;  %1232 = vmatpush.bf16.msrb.mxu2 %v1719_v59 }
 0x15d   : > { %630 = vst [vmem:[#allocation3 + $0x51] sm:$0xff] %v2196_v49  ;;  %v665_v50 = vpack.c.bf16 %v2196_v49, %v2192_v35 }
 0x15f   : > { %915 = vmatmul.bf16.gmra.mxu3 %v665_v50 }
 0x160   : > { %1233 = vmatpush.bf16.msrb.mxu2 %v1718_v63 }
 0x164   : > { %v638_v52 = vld [vmem:[#allocation3 + $0x50] sm:$0xff]  ;;  %1234 = vmatpush.bf16.msrb.mxu2 %v1717_v3 }
 0x165   : > { %v653_v53 = vld [vmem:[#allocation3 + $0x4a] sm:$0xff]  ;;  %v654_v54 = vld [vmem:[#allocation3 + $0x52] sm:$0xff]  ;;  %v664_v55 = vpack.c.bf16 %v638_v52, %v637_v51 }
 0x166   : > { %v666_v56 = vpack.c.bf16 %v654_v54, %v653_v53 }
 0x167   : > { %886 = vmatmul.bf16.gmra.mxu2 %v664_v55 }
 0x168   : > { %944 = vmatmul.bf16.gmra.mxu1 %v666_v56 }
 0x1ae   : > { %v901_v4 = vpop.f32.mrf.mxu3 }
 0x1b1   : > { %v930_v5 = vpop.f32.mrf.mxu1 }
 0x1b6   : > { %v872_v10 = vpop.f32.mrf.mxu2  ;;  %v903_v12 = vpop.f32.mrf.mxu3 }
 0x1b7   : > { %v873_v11 = vadd.f32 %v2240_v9, %v872_v10 }
 0x1b9   : > { %v902_v13 = vadd.f32 %v901_v4, %v873_v11  ;;  %v932_v14 = vpop.f32.mrf.mxu1 }
 0x1bb   : > { %v931_v15 = vadd.f32 %v930_v5, %v902_v13 }
 0x1bd   : > { %v950_v16 = vmax.f32 %v931_v15, 0.0 }
 0x1be   : > { %v874_v17 = vpop.f32.mrf.mxu2 }
 0x1bf   : > { %958 = vst [vmem:[#allocation3 + $0x1] sm:$0xff] %v950_v16  ;;  %v875_v18 = vadd.f32 %v2240_v9, %v874_v17 }
 0x1c1   : > { %v904_v19 = vadd.f32 %v903_v12, %v875_v18 }
 0x1c2   : > { %v906_v20 = vpop.f32.mrf.mxu3 }
 0x1c3   : > { %v933_v21 = vadd.f32 %v932_v14, %v904_v19 }
 0x1c5   : > { %v935_v22 = vpop.f32.mrf.mxu1  ;;  %v951_v24 = vmax.f32 %v933_v21, 0.0 }
 0x1c6   : > { %v966_v30 = vld [vmem:[#allocation3] sm:$0xff] }
 0x1c7   : > { %959 = vst [vmem:[#allocation3 + $0x9] sm:$0xff] %v951_v24  ;;  %v991_v25 = vpack.c.bf16 %v951_v24, %v950_v16 }
 0x1c9   : > { %1235 = vmatmul.bf16.vlgmr.msrb.gmra.mxu2 %v991_v25 }
 0x1ca   : > { %v877_v26 = vpop.f32.mrf.mxu2  ;;  %v908_v28 = vpop.f32.mrf.mxu3 }
 0x1cb   : > { %v878_v27 = vadd.f32 %v2240_v9, %v877_v26 }
 0x1cd   : > { %v907_v29 = vadd.f32 %v906_v20, %v878_v27  ;;  %v937_v31 = vpop.f32.mrf.mxu1 }
 0x1ce   : > { %v967_v32 = vld [vmem:[#allocation3 + $0x8] sm:$0xff] }
 0x1cf   : > { %v982_v33 = vld [vmem:[#allocation3 + $0x2] sm:$0xff]  ;;  %v983_v34 = vld [vmem:[#allocation3 + $0xa] sm:$0xff]  ;;  %v936_v36 = vadd.f32 %v935_v22, %v907_v29  ;;  %v990_v37 = vpack.c.bf16 %v967_v32, %v966_v30 }
 0x1d0   : > { %v992_v39 = vpack.c.bf16 %v983_v34, %v982_v33 }
 0x1d1   : > { %v952_v40 = vmax.f32 %v936_v36, 0.0  ;;  %1206 = vmatmul.bf16.vlgmr.msrb.gmra.mxu0 %v990_v37 }
 0x1d2   : > { %1264 = vmatmul.bf16.vlgmr.msrb.gmra.mxu3 %v992_v39  ;;  %v879_v41 = vpop.f32.mrf.mxu2  ;;  %v911_v45 = vpop.f32.mrf.mxu3 }
 0x1d3   : > { %960 = vst [vmem:[#allocation3 + $0x19] sm:$0xff] %v952_v40  ;;  %v880_v42 = vadd.f32 %v2240_v9, %v879_v41 }
 0x1d5   : > { %v909_v44 = vadd.f32 %v908_v28, %v880_v42  ;;  %v940_v47 = vpop.f32.mrf.mxu1  ;;  %v1328_v42 = vld [vmem:[%s2351_s7 + $0x70] sm:$0xff] }
 0x1d7   : > { %v938_v46 = vadd.f32 %v937_v31, %v909_v44  ;;  %v1327_v44 = vld [vmem:[%s2351_s7 + $0x68] sm:$0xff] }
 0x1d9   : > { %v953_v50 = vmax.f32 %v938_v46, 0.0 }
 0x1da   : > { %v882_v51 = vpop.f32.mrf.mxu2  ;;  %v913_v56 = vpop.f32.mrf.mxu3  ;;  %v968_v57 = vld [vmem:[#allocation3 + $0x18] sm:$0xff] }
 0x1db   : > { %961 = vst [vmem:[#allocation3 + $0x21] sm:$0xff] %v953_v50  ;;  %v883_v52 = vadd.f32 %v2240_v9, %v882_v51  ;;  %v994_v53 = vpack.c.bf16 %v953_v50, %v952_v40  ;;  %v1325_v50 = vld [vmem:[%s2351_s7 + $0x58] sm:$0xff] }
 0x1dd   : > { %v912_v54 = vadd.f32 %v911_v45, %v883_v52  ;;  %1240 = vmatmul.bf16.gmra.mxu2 %v994_v53  ;;  %v942_v58 = vpop.f32.mrf.mxu1  ;;  %v1324_v53 = vld [vmem:[%s2351_s7 + $0x50] sm:$0xff] }
 0x1df   : > { %v941_v55 = vadd.f32 %v940_v47, %v912_v54  ;;  %v1326_v47 = vld [vmem:[%s2351_s7 + $0x60] sm:$0xff]  ;;  %v1323_v54 = vld [vmem:[%s2351_s7 + $0x48] sm:$0xff] }
 0x1e1   : > { %v954_v38 = vmax.f32 %v941_v55, 0.0 }
 0x1e2   : > { %v884_v59 = vpop.f32.mrf.mxu2  ;;  %v969_v61 = vld [vmem:[#allocation3 + $0x20] sm:$0xff]  ;;  %v916_v10 = vpop.f32.mrf.mxu3 }
 0x1e3   : > { %v984_v62 = vld [vmem:[#allocation3 + $0x1a] sm:$0xff]  ;;  %v985_v63 = vld [vmem:[#allocation3 + $0x22] sm:$0xff]  ;;  %962 = vst [vmem:[#allocation3 + $0x31] sm:$0xff] %v954_v38  ;;  %v885_v0 = vadd.f32 %v2240_v9, %v884_v59  ;;  %v993_v2 = vpack.c.bf16 %v969_v61, %v968_v57 }
 0x1e4   : > { %v995_v3 = vpack.c.bf16 %v985_v63, %v984_v62  ;;  %v1321_v57 = vld [vmem:[%s2351_s7 + $0x38] sm:$0xff]  ;;  %v1320_v62 = vld [vmem:[%s2351_s7 + $0x30] sm:$0xff]  ;;  %v1319_v63 = vld [vmem:[%s2351_s7 + $0x28] sm:$0xff] }
 0x1e5   : > { %v914_v4 = vadd.f32 %v913_v56, %v885_v0  ;;  %1211 = vmatmul.bf16.gmra.mxu0 %v993_v2  ;;  %v945_v13 = vpop.f32.mrf.mxu1 }
 0x1e6   : > { %1269 = vmatmul.bf16.gmra.mxu3 %v995_v3 }
 0x1e7   : > { %v943_v5 = vadd.f32 %v942_v58, %v914_v4  ;;  %v1796_v4 = vld [vmem:[%s2350_s6] ss:$0 sm:$0xff] }
 0x1e9   : > { %v955_v7 = vmax.f32 %v943_v5, 0.0 }
 0x1ea   : > { %v887_v8 = vpop.f32.mrf.mxu2  ;;  %v970_v17 = vld [vmem:[#allocation3 + $0x30] sm:$0xff]  ;;  %v918_v26 = vpop.f32.mrf.mxu3 }
 0x1eb   : > { %963 = vst [vmem:[#allocation3 + $0x39] sm:$0xff] %v955_v7  ;;  %v888_v11 = vadd.f32 %v2240_v9, %v887_v8  ;;  %v997_v12 = vpack.c.bf16 %v955_v7, %v954_v38  ;;  %v1322_v38 = vld [vmem:[%s2351_s7 + $0x40] sm:$0xff] }
 0x1ed   : > { %v917_v14 = vadd.f32 %v916_v10, %v888_v11  ;;  %1245 = vmatmul.bf16.gmra.mxu2 %v997_v12  ;;  %v947_v28 = vpop.f32.mrf.mxu1 }
 0x1ef   : > { %v946_v15 = vadd.f32 %v945_v13, %v917_v14  ;;  %v1318_v13 = vld [vmem:[%s2351_s7 + $0x20] sm:$0xff] }
 0x1f1   : > { %v956_v16 = vmax.f32 %v946_v15, 0.0 }
 0x1f2   : > { %v889_v18 = vpop.f32.mrf.mxu2  ;;  %v971_v19 = vld [vmem:[#allocation3 + $0x38] sm:$0xff] }
 0x1f3   : > { %v986_v20 = vld [vmem:[#allocation3 + $0x32] sm:$0xff]  ;;  %v987_v21 = vld [vmem:[#allocation3 + $0x3a] sm:$0xff]  ;;  %964 = vst [vmem:[#allocation3 + $0x49] sm:$0xff] %v956_v16  ;;  %v890_v22 = vadd.f32 %v2240_v9, %v889_v18  ;;  %v996_v24 = vpack.c.bf16 %v971_v19, %v970_v17 }
 0x1f4   : > { %v998_v25 = vpack.c.bf16 %v987_v21, %v986_v20  ;;  %v1329_v9 = vld [vmem:[%s2351_s7 + $0x78] sm:$0xff]  ;;  %v1316_v21 = vld [vmem:[%s2351_s7 + $0x10] sm:$0xff] }
 0x1f5   : > { %v919_v27 = vadd.f32 %v918_v26, %v890_v22  ;;  %1216 = vmatmul.bf16.gmra.mxu0 %v996_v24  ;;  %1331 = vmatpush.msra.mxu1 %v1329_v9  ;;  %v1315_v22 = vld [vmem:[%s2351_s7 + $0x8] sm:$0xff] }
 0x1f6   : > { %1274 = vmatmul.bf16.gmra.mxu3 %v998_v25 }
 0x1f7   : > { %v948_v29 = vadd.f32 %v947_v28, %v919_v27  ;;  %1332 = vmatpush.msra.mxu1 %v1328_v42 }
 0x1f9   : > { %v957_v30 = vmax.f32 %v948_v29, 0.0  ;;  %1333 = vmatpush.msra.mxu1 %v1327_v44  ;;  %v1314_v29 = vld [vmem:[%s2351_s7] sm:$0xff] }
 0x1fa   : > { %v972_v32 = vld [vmem:[#allocation3 + $0x48] sm:$0xff] }
 0x1fb   : > { %965 = vst [vmem:[#allocation3 + $0x51] sm:$0xff] %v957_v30  ;;  %v1000_v31 = vpack.c.bf16 %v957_v30, %v956_v16  ;;  %1334 = vmatpush.msra.mxu1 %v1326_v47  ;;  %v1317_v16 = vld [vmem:[%s2351_s7 + $0x18] sm:$0xff] }
 0x1fd   : > { %1250 = vmatmul.bf16.gmra.mxu2 %v1000_v31  ;;  %1335 = vmatpush.msra.mxu1 %v1325_v50 }
 0x1ff   : > { %1336 = vmatpush.msra.mxu1 %v1324_v53 }
 0x201   : > { %1337 = vmatpush.msra.mxu1 %v1323_v54 }
 0x202   : > { %v973_v33 = vld [vmem:[#allocation3 + $0x50] sm:$0xff] }
 0x203   : > { %v988_v34 = vld [vmem:[#allocation3 + $0x4a] sm:$0xff]  ;;  %v989_v36 = vld [vmem:[#allocation3 + $0x52] sm:$0xff]  ;;  %v999_v37 = vpack.c.bf16 %v973_v33, %v972_v32  ;;  %1338 = vmatpush.msra.mxu1 %v1322_v38 }
 0x204   : > { %v1001_v39 = vpack.c.bf16 %v989_v36, %v988_v34 }
 0x205   : > { %1221 = vmatmul.bf16.gmra.mxu0 %v999_v37  ;;  %1339 = vmatpush.msra.mxu1 %v1321_v57 }
 0x206   : > { %1279 = vmatmul.bf16.gmra.mxu3 %v1001_v39 }
 0x207   : > { %1340 = vmatpush.msra.mxu1 %v1320_v62 }
 0x209   : > { %1341 = vmatpush.msra.mxu1 %v1319_v63 }
 0x20b   : > { %1342 = vmatpush.msra.mxu1 %v1318_v13 }
 0x20d   : > { %1343 = vmatpush.msra.mxu1 %v1317_v16 }
 0x20f   : > { %1344 = vmatpush.msra.mxu1 %v1316_v21 }
 0x211   : > { %1345 = vmatpush.msra.mxu1 %v1315_v22 }
 0x213   : > { %1346 = vmatpush.msra.mxu1 %v1314_v29 }
 0x24c   : > { %v1236_v40 = vpop.f32.mrf.mxu2 }
 0x24e   : > { %v1207_v41 = vpop.f32.mrf.mxu0 }
 0x24f   : > { %v1208_v11 = vadd.f32 %v1796_v4, %v1207_v41 }
 0x251   : > { %v1237_v17 = vadd.f32 %v1236_v40, %v1208_v11 }
 0x254   : > { %v1238_v46 = vpop.f32.mrf.mxu2 }
 0x255   : > { %v1265_v45 = vpop.f32.mrf.mxu3 }
 0x256   : > { %v1209_v51 = vpop.f32.mrf.mxu0  ;;  %v1266_v25 = vadd.f32 %v1265_v45, %v1237_v17 }
 0x257   : > { %v1210_v7 = vadd.f32 %v1796_v4, %v1209_v51 }
 0x258   : > { %v1285_v37 = vadd.f32 %v1266_v25, %v2126_v43 }
 0x259   : > { %v1239_v14 = vadd.f32 %v1238_v46, %v1210_v7 }
 0x25a   : > { %v1293_v47 = vmax.f32 %v1285_v37, 0.0 }
 0x25d   : > { %v1267_v52 = vpop.f32.mrf.mxu3 }
 0x25e   : > { %v1268_v18 = vadd.f32 %v1267_v52, %v1239_v14 }
 0x260   : > { %v1241_v55 = vpop.f32.mrf.mxu2  ;;  %v1286_v31 = vadd.f32 %v1268_v18, %v2130_v48 }
 0x262   : > { %v1212_v56 = vpop.f32.mrf.mxu0  ;;  %v1294_v41 = vmax.f32 %v1286_v31, 0.0 }
 0x263   : > { %v1213_v12 = vadd.f32 %v1796_v4, %v1212_v56 }
 0x264   : > { %v1301_v53 = vadd.f32 %v1294_v41, %v1293_v47 }
 0x265   : > { %v1242_v19 = vadd.f32 %v1241_v55, %v1213_v12 }
 0x268   : > { %v1243_v59 = vpop.f32.mrf.mxu2 }
 0x269   : > { %v1270_v58 = vpop.f32.mrf.mxu3 }
 0x26a   : > { %v1214_v61 = vpop.f32.mrf.mxu0  ;;  %v1271_v26 = vadd.f32 %v1270_v58, %v1242_v19 }
 0x26b   : > { %v1215_v15 = vadd.f32 %v1796_v4, %v1214_v61 }
 0x26c   : > { %v1287_v39 = vadd.f32 %v1271_v26, %v2136_v60 }
 0x26d   : > { %v1244_v27 = vadd.f32 %v1243_v59, %v1215_v15 }
 0x26e   : > { %v1295_v50 = vmax.f32 %v1287_v39, 0.0 }
 0x270   : > { %v1246_v2 = vpop.f32.mrf.mxu2  ;;  %v1302_v60 = vadd.f32 %v1301_v53, %v1295_v50 }
 0x271   : > { %v1272_v0 = vpop.f32.mrf.mxu3 }
 0x272   : > { %v1217_v3 = vpop.f32.mrf.mxu0  ;;  %v1273_v32 = vadd.f32 %v1272_v0, %v1244_v27 }
 0x273   : > { %v1218_v20 = vadd.f32 %v1796_v4, %v1217_v3 }
 0x274   : > { %v1288_v42 = vadd.f32 %v1273_v32, %v2140_v1 }
 0x275   : > { %v1247_v33 = vadd.f32 %v1246_v2, %v1218_v20 }
 0x276   : > { %v1296_v54 = vmax.f32 %v1288_v42, 0.0 }
 0x278   : > { %v1248_v10 = vpop.f32.mrf.mxu2  ;;  %v1303_v1 = vadd.f32 %v1302_v60, %v1296_v54 }
 0x279   : > { %v1275_v5 = vpop.f32.mrf.mxu3 }
 0x27a   : > { %v1219_v8 = vpop.f32.mrf.mxu0  ;;  %v1276_v9 = vadd.f32 %v1275_v5, %v1247_v33 }
 0x27b   : > { %v1220_v28 = vadd.f32 %v1796_v4, %v1219_v8 }
 0x27c   : > { %v1289_v48 = vadd.f32 %v1276_v9, %v2146_v6 }
 0x27d   : > { %v1249_v40 = vadd.f32 %v1248_v10, %v1220_v28 }
 0x27e   : > { %v1297_v56 = vmax.f32 %v1289_v48, 0.0 }
 0x280   : > { %v1251_v36 = vpop.f32.mrf.mxu2  ;;  %v1304_v62 = vadd.f32 %v1303_v1, %v1297_v56 }
 0x281   : > { %v1277_v24 = vpop.f32.mrf.mxu3 }
 0x282   : > { %v1222_v30 = vpop.f32.mrf.mxu0  ;;  %v1278_v44 = vadd.f32 %v1277_v24, %v1249_v40 }
 0x283   : > { %v1223_v34 = vadd.f32 %v1796_v4, %v1222_v30 }
 0x284   : > { %v1290_v43 = vadd.f32 %v1278_v44, %v2168_v23 }
 0x285   : > { %v1252_v45 = vadd.f32 %v1251_v36, %v1223_v34 }
 0x286   : > { %v1298_v58 = vmax.f32 %v1290_v43, 0.0 }
 0x288   : > { %v1253_v57 = vpop.f32.mrf.mxu2  ;;  %v1305_v0 = vadd.f32 %v1304_v62, %v1298_v58 }
 0x289   : > { %v1280_v46 = vpop.f32.mrf.mxu3 }
 0x28a   : > { %v1281_v51 = vadd.f32 %v1280_v46, %v1252_v45  ;;  %v1224_v52 = vpop.f32.mrf.mxu0 }
 0x28b   : > { %v1225_v55 = vadd.f32 %v1796_v4, %v1224_v52 }
 0x28c   : > { %v1291_v38 = vadd.f32 %v1281_v51, %v2192_v35 }
 0x28d   : > { %v1254_v59 = vadd.f32 %v1253_v57, %v1225_v55 }
 0x28e   : > { %v1299_v6 = vmax.f32 %v1291_v38, 0.0 }
 0x290   : > { %v1306_v3 = vadd.f32 %v1305_v0, %v1299_v6 }
 0x291   : > { %v1282_v61 = vpop.f32.mrf.mxu3 }
 0x292   : > { %v1283_v63 = vadd.f32 %v1282_v61, %v1254_v59 }
 0x294   : > { %v1292_v2 = vadd.f32 %v1283_v63, %v2196_v49  ;;  %v1330_v49 = vld [vmem:[%s2352_s8] sm:$0x1] }
 0x296   : > { %v1300_v23 = vmax.f32 %v1292_v2, 0.0 }
 0x298   : > { %v1307_v4 = vadd.f32 %v1306_v3, %v1300_v23 }
 0x29a   : > { %v1308_v5 = vrot.slane %v1307_v4, 4 }
 0x29c   : > { %v1309_v7 = vadd.f32 %v1308_v5, %v1307_v4 }
 0x29e   : > { %v1310_v8 = vrot.slane %v1309_v7, 2 }
 0x2a0   : > { %v1311_v35 = vadd.f32 %v1310_v8, %v1309_v7 }
 0x2a2   : > { %v1312_v10 = vrot.slane %v1311_v35, 1 }
 0x2a4   : > { %v1313_v11 = vadd.f32 %v1312_v10, %v1311_v35 }
 0x2a6   : > { %1347 = vmatmul.f32.vlgmr.msra.gmra.mxu1 %v1313_v11 }
 0x323   : > { %v1348_v12 = vpop.f32.mrf.mxu1 }
 0x324   : > { %v1349_v13 = vadd.f32 %v1348_v12, %v1330_v49 }
 0x326   : > { %1351 = vst [vmem:[%s324_s25] sm:$0x1] %v1349_v13 }
 0x327   : > { %1824 = shalt.err (!%p1821_p3)
}
 0x328   : > { %1733 = dma.vmem_to_hbm [thread:$0]  (%p1951_p5), %s1364_s26, 16, %s1366_s27, %s1353_s28  }
 0x329 PF: > { %p1739_p4 = scmp.ge.s32.totalorder %s1859_s12, 2  ;;  %s1377_s16 = sand.u32 1, %s1847_s30  }
 0x32a   : > { %s1378_s22 = scalar_lea.sflag [#allocation5], %s1377_s16 }
 0x32b   : > { %p1736_p7 = pnand %p1739_p4, %p1955_p6 }
 0x32d   : > { %p1737_p8 = pneg %p1736_p7 }
 0x32f   : > { %1842 = dma.done.wait (%p1737_p8), %s1378_s22, 16  }
 0x330   : > { %1844 = vsyncadd (%p1737_p8), %s1378_s22, 4294967280  ;;  %p19_p9 = scmp.ge.s32.totalorder %s1938_s15, 4   ;;  %s2356_s30 = smov %s1851_s10 }
 0x331   : > { %s2357_s10 = smov %s1855_s11  ;;  %s2358_s11 = smov %s1949_s18 }
 0x332   : > { %s2359_s12 = smov %s1938_s15  ;;  %21 = sbr.rel (!%p19_p9) target bundleno = 3 (0x3), region = 91 }
 0x337   :  { %1383 = vsyncpa [#allocation5], 1 }
 0x338   :  { %1385 = vsyncpa [#allocation5 + $0x1], 1 }

</bundles_post_ra>
